<compile_context>
chip_gen: v6e
topology: v6e:2x2x1
jax: 0.10.0
libtpu: 0.0.40
codegen_flags: <defaults>
</compile_context>

<pallas_src>
import functools

import jax
import jax.numpy as jnp
from jax.experimental import pallas as pl
from jax.experimental.pallas import tpu as pltpu

IGNORE_INDEX = 255
LANES = 128


def _focal_ce_kernel(preds_ref, labels_ref, sum_ref, cnt_ref,
                     sum_acc, cnt_acc, *, n_pixels, ignore_index):
    """Accumulates the sum of per-pixel CE losses and the count of valid pixels.

    preds_ref : (C, S_TILE, 128) logits (source dtype; cast to f32 here)
    labels_ref: (S_TILE, 128) int32 class ids
    sum_ref   : (1, 1) f32 output  -- written on the last grid step only
    cnt_ref   : (1, 1) f32 output  -- written on the last grid step only
    sum_acc   : (S_TILE, 128) f32 VMEM scratch (running CE sum, VPU adds)
    cnt_acc   : (S_TILE, 128) f32 VMEM scratch (running valid-pixel count)
    """
    i_n = pl.program_id(0)          # batch element
    i_t = pl.program_id(1)          # pixel tile within the batch element
    is_first = (i_n == 0) & (i_t == 0)
    is_last = ((i_n == pl.num_programs(0) - 1)
               & (i_t == pl.num_programs(1) - 1))

    @pl.when(is_first)
    def _():
        sum_acc[...] = jnp.zeros_like(sum_acc)
        cnt_acc[...] = jnp.zeros_like(cnt_acc)

    x = preds_ref[...].astype(jnp.float32)        # (C, S, 128)
    labels = labels_ref[...]                      # (S, 128) int32
    s_tile = labels.shape[0]

    # Numerically stable log-softmax pieces.  Axis 0 (classes) is the major
    # axis of the block, so these reductions are elementwise VPU max/add
    # across class slices -- no XLU sublane reductions.
    m = jnp.max(x, axis=0)                                   # (S, 128)
    sum_exp = jnp.sum(jnp.exp(x - m[None]), axis=0)          # (S, 128)
    lse = jnp.log(sum_exp) + m                               # (S, 128)

    # Gather the logit at the label id via a fused select-sum (no bool->f32
    # one-hot + multiply).  NOTE: a real class id equal to ignore_index would
    # alias (inherent to ignore_index semantics, same as PyTorch).
    cls_ids = jax.lax.broadcasted_iota(jnp.int32, x.shape, 0)
    picked = jnp.sum(jnp.where(cls_ids == labels[None], x, 0.0), axis=0)

    per_pixel_ce = lse - picked                              # (S, 128)

    # Validity: not ignore_index AND inside the un-padded pixel range.  The
    # pixel-index compare masks both the 128-alignment pad and any ragged
    # tail block (whose un-DMA'd region contains garbage).
    s_idx = jax.lax.broadcasted_iota(jnp.int32, labels.shape, 0)
    l_idx = jax.lax.broadcasted_iota(jnp.int32, labels.shape, 1)
    pix = (i_t * s_tile + s_idx) * LANES + l_idx
    valid = (labels != ignore_index) & (pix < n_pixels)

    sum_acc[...] += jnp.where(valid, per_pixel_ce, 0.0)
    cnt_acc[...] += valid.astype(jnp.float32)

    @pl.when(is_last)
    def _():
        sum_ref[...] = jnp.sum(sum_acc[...], keepdims=True)
        cnt_ref[...] = jnp.sum(cnt_acc[...], keepdims=True)


def _choose_s_tile(n_classes, s_total, itemsize):
    """Sublane-tiles (rows of 128 pixels) per grid step.

    Targets ~1 MiB of logits per block (past the measured HBM-roofline knee)
    while keeping double-buffered VMEM usage a few MiB (fits default scoped
    VMEM on v5e/v6e/v7x).  Must be a multiple of 8 or equal the full extent.
    """
    target_bytes = 1 << 20
    s = target_bytes // max(1, n_classes * LANES * itemsize)
    s = max(8, min(1024, (s // 8) * 8))
    if s_total <= s:
        return s_total          # full-extent block along this dim: always legal
    return s


@functools.partial(jax.jit, static_argnames=("alpha", "gamma", "ignore_index"))
def focal_loss(preds, labels, alpha=0.5, gamma=2, ignore_index=IGNORE_INDEX):
    """Matches FocalLoss.forward(preds, labels) from the PyTorch module.

    preds : (N, C, H, W) float (NCHW, like PyTorch), any float dtype
    labels: (N, H, W) int      (ignore_index pixels are excluded from the mean)
    returns scalar float32 loss.

    Note: if every pixel is ignore_index the result is NaN (0/0), matching
    nn.CrossEntropyLoss semantics.
    """
    N, C, H, W = preds.shape
    P = H * W
    P_pad = ((P + LANES - 1) // LANES) * LANES
    S_total = P_pad // LANES

    # Free reshape (no transpose, no upcast): NCHW -> (N, C, P).
    preds_r = preds.reshape(N, C, P)
    labels_r = labels.reshape(N, P).astype(jnp.int32)
    if P_pad != P:
        # Uncommon path (H*W not a multiple of 128): tiny pad so the last dim
        # can be split into (S_total, 128).  Padded pixels are masked in-kernel.
        preds_r = jnp.pad(preds_r, ((0, 0), (0, 0), (0, P_pad - P)))
        labels_r = jnp.pad(labels_r, ((0, 0), (0, P_pad - P)),
                           constant_values=ignore_index)
    preds_r = preds_r.reshape(N, C, S_total, LANES)      # free reshape
    labels_r = labels_r.reshape(N, S_total, LANES)

    s_tile = _choose_s_tile(C, S_total, preds_r.dtype.itemsize)
    grid = (N, pl.cdiv(S_total, s_tile))

    kernel = functools.partial(_focal_ce_kernel,
                               n_pixels=P, ignore_index=ignore_index)

    sum_out, cnt_out = pl.pallas_call(
        kernel,
        out_shape=(
            jax.ShapeDtypeStruct((1, 1), jnp.float32),
            jax.ShapeDtypeStruct((1, 1), jnp.float32),
        ),
        grid_spec=pltpu.PrefetchScalarGridSpec(
            num_scalar_prefetch=0,
            grid=grid,
            in_specs=[
                # (batch squeezed, all classes, s_tile sublane-rows, 128 lanes)
                pl.BlockSpec((pl.Squeezed(), C, s_tile, LANES),
                             lambda n, i: (n, 0, i, 0)),
                pl.BlockSpec((pl.Squeezed(), s_tile, LANES),
                             lambda n, i: (n, i, 0)),
            ],
            out_specs=[
                pl.BlockSpec((1, 1), lambda n, i: (0, 0)),
                pl.BlockSpec((1, 1), lambda n, i: (0, 0)),
            ],
            scratch_shapes=[
                pltpu.VMEM((s_tile, LANES), jnp.float32),
                pltpu.VMEM((s_tile, LANES), jnp.float32),
            ],
        ),
        compiler_params=pltpu.CompilerParams(
            # Both axes feed a single global accumulator / output block, so
            # they must stay "arbitrary".
            # TODO(synk): on v7x, split pixels across the 2 TensorCores with a
            # leading parallel axis + per-core partial (sum, cnt) outputs.
            dimension_semantics=("arbitrary", "arbitrary"),
            # Blocks are budgeted at ~1 MiB, so default scoped VMEM suffices on
            # every generation; set explicitly for headroom (well under v7x's
            # 64 MiB physical).
            vmem_limit_bytes=32 * 1024 * 1024,
        ),
    )(preds_r, labels_r)

    ce = sum_out[0, 0] / cnt_out[0, 0]     # mean CE over valid pixels

    # Focal transform (scalar glue, identical to the PyTorch forward).
    logpt = -ce
    pt = jnp.exp(logpt)
    loss = -((1.0 - pt) ** gamma) * alpha * logpt
    return loss


def _focal_loss_reference(preds, labels, alpha=0.5, gamma=2):
    """Pure-JAX reference mirroring nn.CrossEntropyLoss(ignore_index=255)."""
    N, C, H, W = preds.shape
    x = jnp.transpose(preds, (0, 2, 3, 1)).reshape(-1, C).astype(jnp.float32)
    y = labels.reshape(-1).astype(jnp.int32)
    valid = y != IGNORE_INDEX
    y_safe = jnp.where(valid, y, 0)
    logp = jax.nn.log_softmax(x, axis=-1)
    per = -jnp.take_along_axis(logp, y_safe[:, None], axis=-1)[:, 0]
    ce = jnp.sum(jnp.where(valid, per, 0.0)) / jnp.sum(valid.astype(jnp.float32))
    logpt = -ce
    pt = jnp.exp(logpt)
    return -((1.0 - pt) ** gamma) * alpha * logpt


if __name__ == "__main__":
    key = jax.random.PRNGKey(0)
    k1, k2, k3 = jax.random.split(key, 3)

    N, C, H, W = 2, 4, 16, 16
    preds = jax.random.normal(k1, (N, C, H, W), dtype=jnp.float32)
    labels = jax.random.randint(k2, (N, H, W), 0, C, dtype=jnp.int32)
    # sprinkle some ignored pixels
    ign_mask = jax.random.uniform(k3, (N, H, W)) < 0.1
    labels = jnp.where(ign_mask, IGNORE_INDEX, labels)

    out = focal_loss(preds, labels, alpha=0.5, gamma=2)
    out = jax.block_until_ready(out)

    ref = _focal_loss_reference(preds, labels, alpha=0.5, gamma=2)
    assert jnp.allclose(out, ref, rtol=1e-5, atol=1e-5), (out, ref)

    print("KERNEL_OK")
</pallas_src>

<mosaic_0001>
module attributes {stable_mosaic.version = 11 : i64} {
  func.func @_focal_ce_kernel(%arg0: i32, %arg1: i32, %arg2: memref<1x4x2x128xf32, #tpu.memory_space<vmem>>, %arg3: memref<1x2x128xi32, #tpu.memory_space<vmem>>, %arg4: memref<1x1xf32, #tpu.memory_space<vmem>>, %arg5: memref<1x1xf32, #tpu.memory_space<vmem>>, %arg6: memref<2x128xf32, #tpu.memory_space<vmem>>, %arg7: memref<2x128xf32, #tpu.memory_space<vmem>>) attributes {dimension_semantics = [#tpu.dimension_semantics<arbitrary>, #tpu.dimension_semantics<arbitrary>], iteration_bounds = array<i64: 2, 1>, scalar_prefetch = 0 : i64, scratch_operands = 2 : i64, tpu.core_type = #tpu.core_type<tc>, window_params = [{transform_indices = @transform_0, window_bounds = array<i64: 1, 4, 2, 128>}, {transform_indices = @transform_1, window_bounds = array<i64: 1, 2, 128>}, {pipeline_mode = #tpu.pipeline_mode<synchronous>, transform_indices = @transform_2, window_bounds = array<i64: 1, 1>}, {pipeline_mode = #tpu.pipeline_mode<synchronous>, transform_indices = @transform_3, window_bounds = array<i64: 1, 1>}]} {
    %c0_i32 = arith.constant 0 : i32
    %0 = arith.cmpi eq, %arg0, %c0_i32 : i32
    %c0_i32_0 = arith.constant 0 : i32
    %1 = arith.cmpi eq, %arg1, %c0_i32_0 : i32
    %2 = arith.andi %0, %1 : i1
    %c1_i32 = arith.constant 1 : i32
    %3 = arith.cmpi eq, %arg0, %c1_i32 : i32
    %c0_i32_1 = arith.constant 0 : i32
    %4 = arith.cmpi eq, %arg1, %c0_i32_1 : i32
    %5 = arith.andi %3, %4 : i1
    %6 = arith.extui %2 : i1 to i32
    %c0_i32_2 = arith.constant 0 : i32
    %7 = arith.cmpi ne, %6, %c0_i32_2 : i32
    scf.if %7 {
      %cst_22 = arith.constant 0.000000e+00 : f32
      %53 = vector.broadcast %cst_22 : f32 to vector<2x128xf32>
      %c0_23 = arith.constant 0 : index
      %c0_24 = arith.constant 0 : index
      %54 = vector.load %arg6[%c0_23, %c0_24] : memref<2x128xf32, #tpu.memory_space<vmem>>, vector<2x128xf32>
      tpu.vector_store %arg6[%c0_23, %c0_24], %53 {strides = array<i32>} : memref<2x128xf32, #tpu.memory_space<vmem>>, vector<2x128xf32>,
      %cst_25 = arith.constant 0.000000e+00 : f32
      %55 = vector.broadcast %cst_25 : f32 to vector<2x128xf32>
      %c0_26 = arith.constant 0 : index
      %c0_27 = arith.constant 0 : index
      %56 = vector.load %arg7[%c0_26, %c0_27] : memref<2x128xf32, #tpu.memory_space<vmem>>, vector<2x128xf32>
      tpu.vector_store %arg7[%c0_26, %c0_27], %55 {strides = array<i32>} : memref<2x128xf32, #tpu.memory_space<vmem>>, vector<2x128xf32>,
    } else {
    }
    %c0 = arith.constant 0 : index
    %c0_3 = arith.constant 0 : index
    %c0_4 = arith.constant 0 : index
    %c0_5 = arith.constant 0 : index
    %8 = vector.load %arg2[%c0, %c0_3, %c0_4, %c0_5] : memref<1x4x2x128xf32, #tpu.memory_space<vmem>>, vector<1x4x2x128xf32>
    %9 = vector.shape_cast %8 : vector<1x4x2x128xf32> to vector<4x2x128xf32>
    %c0_6 = arith.constant 0 : index
    %c0_7 = arith.constant 0 : index
    %c0_8 = arith.constant 0 : index
    %10 = vector.load %arg3[%c0_6, %c0_7, %c0_8] : memref<1x2x128xi32, #tpu.memory_space<vmem>>, vector<1x2x128xi32>
    %11 = vector.shape_cast %10 : vector<1x2x128xi32> to vector<2x128xi32>
    %cst = arith.constant dense<0xFF800000> : vector<2x128xf32>
    %12 = vector.multi_reduction <maximumf>, %9, %cst [0] : vector<4x2x128xf32> to vector<2x128xf32>
    %13 = vector.shape_cast %12 : vector<2x128xf32> to vector<1x2x128xf32>
    %14 = vector.broadcast %13 : vector<1x2x128xf32> to vector<4x2x128xf32>
    %15 = arith.subf %9, %14 : vector<4x2x128xf32>
    %16 = math.exp %15 : vector<4x2x128xf32>
    %cst_9 = arith.constant dense<0.000000e+00> : vector<2x128xf32>
    %17 = vector.multi_reduction <add>, %16, %cst_9 [0] : vector<4x2x128xf32> to vector<2x128xf32>
    %18 = math.log %17 : vector<2x128xf32>
    %19 = arith.addf %18, %12 : vector<2x128xf32>
    %20 = tpu.iota {dimensions = array<i32: 0>} : vector<4x2x128xi32>
    %21 = vector.shape_cast %11 : vector<2x128xi32> to vector<1x2x128xi32>
    %22 = vector.broadcast %21 : vector<1x2x128xi32> to vector<4x2x128xi32>
    %23 = arith.cmpi eq, %20, %22 : vector<4x2x128xi32>
    %cst_10 = arith.constant 0.000000e+00 : f32
    %24 = vector.broadcast %cst_10 : f32 to vector<4x2x128xf32>
    %25 = arith.select %23, %9, %24 : vector<4x2x128xi1>, vector<4x2x128xf32>
    %cst_11 = arith.constant dense<0.000000e+00> : vector<2x128xf32>
    %26 = vector.multi_reduction <add>, %25, %cst_11 [0] : vector<4x2x128xf32> to vector<2x128xf32>
    %27 = arith.subf %19, %26 : vector<2x128xf32>
    %28 = tpu.iota {dimensions = array<i32: 0>} : vector<2x128xi32>
    %29 = tpu.iota {dimensions = array<i32: 1>} : vector<2x128xi32>
    %c2_i32 = arith.constant 2 : i32
    %30 = arith.muli %arg1, %c2_i32 : i32
    %31 = vector.broadcast %30 : i32 to vector<2x128xi32>
    %32 = arith.addi %31, %28 : vector<2x128xi32>
    %c128_i32 = arith.constant 128 : i32
    %33 = vector.broadcast %c128_i32 : i32 to vector<2x128xi32>
    %34 = arith.muli %32, %33 : vector<2x128xi32>
    %35 = arith.addi %34, %29 : vector<2x128xi32>
    %c255_i32 = arith.constant 255 : i32
    %36 = vector.broadcast %c255_i32 : i32 to vector<2x128xi32>
    %37 = arith.cmpi ne, %11, %36 : vector<2x128xi32>
    %c256_i32 = arith.constant 256 : i32
    %38 = vector.broadcast %c256_i32 : i32 to vector<2x128xi32>
    %39 = arith.cmpi slt, %35, %38 : vector<2x128xi32>
    %40 = arith.andi %37, %39 : vector<2x128xi1>
    %c0_12 = arith.constant 0 : index
    %c0_13 = arith.constant 0 : index
    %41 = vector.load %arg6[%c0_12, %c0_13] : memref<2x128xf32, #tpu.memory_space<vmem>>, vector<2x128xf32>
    %cst_14 = arith.constant 0.000000e+00 : f32
    %42 = vector.broadcast %cst_14 : f32 to vector<2x128xf32>
    %43 = arith.select %40, %27, %42 : vector<2x128xi1>, vector<2x128xf32>
    %44 = arith.addf %41, %43 : vector<2x128xf32>
    %c0_15 = arith.constant 0 : index
    %c0_16 = arith.constant 0 : index
    %45 = vector.load %arg6[%c0_15, %c0_16] : memref<2x128xf32, #tpu.memory_space<vmem>>, vector<2x128xf32>
    tpu.vector_store %arg6[%c0_15, %c0_16], %44 {strides = array<i32>} : memref<2x128xf32, #tpu.memory_space<vmem>>, vector<2x128xf32>,
    %c0_17 = arith.constant 0 : index
    %c0_18 = arith.constant 0 : index
    %46 = vector.load %arg7[%c0_17, %c0_18] : memref<2x128xf32, #tpu.memory_space<vmem>>, vector<2x128xf32>
    %47 = arith.extui %40 : vector<2x128xi1> to vector<2x128xi32>
    %48 = arith.sitofp %47 : vector<2x128xi32> to vector<2x128xf32>
    %49 = arith.addf %46, %48 : vector<2x128xf32>
    %c0_19 = arith.constant 0 : index
    %c0_20 = arith.constant 0 : index
    %50 = vector.load %arg7[%c0_19, %c0_20] : memref<2x128xf32, #tpu.memory_space<vmem>>, vector<2x128xf32>
    tpu.vector_store %arg7[%c0_19, %c0_20], %49 {strides = array<i32>} : memref<2x128xf32, #tpu.memory_space<vmem>>, vector<2x128xf32>,
    %51 = arith.extui %5 : i1 to i32
    %c0_i32_21 = arith.constant 0 : i32
    %52 = arith.cmpi ne, %51, %c0_i32_21 : i32
    scf.if %52 {
      %c0_22 = arith.constant 0 : index
      %c0_23 = arith.constant 0 : index
      %53 = vector.load %arg6[%c0_22, %c0_23] : memref<2x128xf32, #tpu.memory_space<vmem>>, vector<2x128xf32>
      %54 = vector.shape_cast %53 : vector<2x128xf32> to vector<1x2x128xf32>
      %cst_24 = arith.constant dense<0.000000e+00> : vector<1xf32>
      %55 = vector.multi_reduction <add>, %54, %cst_24 [1, 2] : vector<1x2x128xf32> to vector<1xf32>
      %56 = vector.shape_cast %55 : vector<1xf32> to vector<1x1x1xf32>
      %57 = vector.extract %56[0, 0, 0] : f32 from vector<1x1x1xf32>
      %58 = vector.broadcast %57 : f32 to vector<1x1xf32>
      %c0_25 = arith.constant 0 : index
      %c0_26 = arith.constant 0 : index
      %59 = vector.load %arg4[%c0_25, %c0_26] : memref<1x1xf32, #tpu.memory_space<vmem>>, vector<1x1xf32>
      tpu.vector_store %arg4[%c0_25, %c0_26], %58 {strides = array<i32>} : memref<1x1xf32, #tpu.memory_space<vmem>>, vector<1x1xf32>,
      %c0_27 = arith.constant 0 : index
      %c0_28 = arith.constant 0 : index
      %60 = vector.load %arg7[%c0_27, %c0_28] : memref<2x128xf32, #tpu.memory_space<vmem>>, vector<2x128xf32>
      %61 = vector.shape_cast %60 : vector<2x128xf32> to vector<1x2x128xf32>
      %cst_29 = arith.constant dense<0.000000e+00> : vector<1xf32>
      %62 = vector.multi_reduction <add>, %61, %cst_29 [1, 2] : vector<1x2x128xf32> to vector<1xf32>
      %63 = vector.shape_cast %62 : vector<1xf32> to vector<1x1x1xf32>
      %64 = vector.extract %63[0, 0, 0] : f32 from vector<1x1x1xf32>
      %65 = vector.broadcast %64 : f32 to vector<1x1xf32>
      %c0_30 = arith.constant 0 : index
      %c0_31 = arith.constant 0 : index
      %66 = vector.load %arg5[%c0_30, %c0_31] : memref<1x1xf32, #tpu.memory_space<vmem>>, vector<1x1xf32>
      tpu.vector_store %arg5[%c0_30, %c0_31], %65 {strides = array<i32>} : memref<1x1xf32, #tpu.memory_space<vmem>>, vector<1x1xf32>,
    } else {
    }
    return
  }
  func.func @transform_0(%arg0: i32, %arg1: i32) -> (i32, i32, i32, i32) {
    %c0_i32 = arith.constant 0 : i32
    %c0_i32_0 = arith.constant 0 : i32
    %c0_i32_1 = arith.constant 0 : i32
    return %arg0, %c0_i32, %arg1, %c0_i32_0 : i32, i32, i32, i32
  }
  func.func @transform_1(%arg0: i32, %arg1: i32) -> (i32, i32, i32) {
    %c0_i32 = arith.constant 0 : i32
    %c0_i32_0 = arith.constant 0 : i32
    return %arg0, %arg1, %c0_i32 : i32, i32, i32
  }
  func.func @transform_2(%arg0: i32, %arg1: i32) -> (i32, i32) {
    %c0_i32 = arith.constant 0 : i32
    %c0_i32_0 = arith.constant 0 : i32
    %c0_i32_1 = arith.constant 0 : i32
    return %c0_i32, %c0_i32_0 : i32, i32
  }
  func.func @transform_3(%arg0: i32, %arg1: i32) -> (i32, i32) {
    %c0_i32 = arith.constant 0 : i32
    %c0_i32_0 = arith.constant 0 : i32
    %c0_i32_1 = arith.constant 0 : i32
    return %c0_i32, %c0_i32_0 : i32, i32
  }
}

</mosaic_0001>

<bundles_post_ra>
// kernel: focal_loss.1
= control target key start
LH: loop header
LB: loop body
LE: loop exit
PB: predicated region body
PF: predicated region fallthrough
CT: control target
= control target key end

     0   :  { %9 = vsyncpa [#allocation5], 0  ;;  %s686_s0 = inlined_call_operand.vmem [shape: f32[2,4,2,128], index: 0, kind: input, shape index: {}]   ;;  %s687_s1 = inlined_call_operand.vmem [shape: s32[2,2,128], index: 1, kind: input, shape index: {}]   ;;  %s688_s2 = inlined_call_operand.hbm [shape: f32[1,1], index: 2, kind: output, shape index: {0}]   ;;  %s689_s3 = inlined_call_operand.hbm [shape: f32[1,1], index: 3, kind: output, shape index: {1}]  }
   0x1   :  { %10 = vsyncpa [#allocation7], 0  ;;  %s594_s12 = smov 0   ;;  %s596_s13 = smov 0  }
   0x2   :  { %s598_s14 = smov 0  }
   0x3 LB: > { %s417_s15 = sadd.s32 4294967295, %s568_s14   ;;  %s28_s16 = sadd.s32 1, %s564_s13  ;;  %s568_s14 = sphi %s598_s14, %s16_s14   ;;  %s564_s13 = sphi %s596_s13, %s694_s13   ;;  %s560_s12 = sphi %s594_s12, %s693_s12  }
   0x4   : > { %p30_p0 = scmp.ge.s32.totalorder %s28_s16, 2  ;;  %p420_p1 = scmp.ge.s32.totalorder %s568_s14, 1 }
   0x5   : > { %p163_p2 = scmp.lt.s32.totalorder %s568_s14, 3 }
   0x6   : > { %s696_s16 = smov (%p30_p0, %s28_s16), 0 }
   0x7   : > { %p164_p3 = pnand %p420_p1, %p163_p2 }
   0x8   : > { %p192_p4 = scmp.lt.s32.totalorder (!%p164_p3), %s560_s12, 1  ;;  %p207_p5 = scmp.eq.s32.totalorder (!%p164_p3), %s560_s12, 0 }
   0x9   : > { %167 = sbr.rel (%p164_p3) target bundleno = 319 (0x13f), region = 28  ;;  %p211_p6 = scmp.eq.s32.totalorder (!%p164_p3), %s560_s12, 1 }
   0xe   : > { %s193_s17 = scalar_select %p192_p4, %s560_s12, 1  ;;  %v570_v0 = vmov (%p207_p5), 0.0  }
   0xf   : > { %215 = sbr.rel (!%p207_p5) target bundleno = 20 (0x14), region = 32  ;;  %216 = vst [vmem:[#allocation2] sm:$0x3] (%p207_p5), %v570_v0  ;;  %217 = vst [vmem:[#allocation3] sm:$0x3] (%p207_p5), %v570_v0 }
  0x10   : > { %s433_s18 = sshll.u32 %s193_s17, 3  ;;  %s423_s19 = sshll.u32 %s193_s17, 1 }
  0x11   : > { %s199_s22 = scalar_lea.vmem %s686_s0, %s433_s18  ;;  %s206_s25 = scalar_lea.vmem %s687_s1, %s423_s19 }
  0x14 PF: > { %v218_v1 = vld [vmem:[%s199_s22] sm:$0x3]  ;;  %v219_v2 = vld [vmem:[%s199_s22 + $0x2] sm:$0x3]  ;;  %v220_v3 = vld [vmem:[%s199_s22 + $0x4] sm:$0x3]  ;;  %v269_v5 = vlaneseq }
  0x15   : > { %v221_v4 = vld [vmem:[%s199_s22 + $0x6] sm:$0x3]  ;;  %vm223_vm0 = vcmask 1041408   ;;  %v222_v18 = vld [vmem:[%s206_s25] sm:$0x3]  ;;  %v571_v28 = vmov 0.0  }
  0x16   : > { %v224_v6 = vsel %vm223_vm0, %v218_v1, -inf  ;;  %v225_v7 = vsel %vm223_vm0, %v219_v2, -inf  ;;  %v226_v8 = vsel %vm223_vm0, %v220_v3, -inf  ;;  %v227_v9 = vsel %vm223_vm0, %v221_v4, -inf  ;;  %v285_v26 = vld [vmem:[#allocation3] sm:$0x3] }
  0x17   : > { %v228_v10 = vmax.f32 %v224_v6, %v225_v7  ;;  %v229_v11 = vmax.f32 %v226_v8, %v227_v9  ;;  %v270_v13 = vshrl.u32 %v269_v5, 7  ;;  %v272_v19 = vand.u32 127, %v269_v5  ;;  %v281_v57 = vld [vmem:[#allocation2] sm:$0x3] }
  0x18   : > { %vm278_vm1 = vcmp.ne.s32.totalorder %v222_v18, 255  ;;  %vm253_vm4 = vcmp.eq.s32.totalorder %v222_v18, 0  ;;  %vm254_vm5 = vcmp.eq.s32.totalorder %v222_v18, 1  ;;  %vm255_vm6 = vcmp.eq.s32.totalorder %v222_v18, 2 }
  0x19   : > { %v230_v12 = vmax.f32 %v228_v10, %v229_v11  ;;  %v276_v20 = vmul.u32 128, %v270_v13  ;;  %v257_v42 = vsel %vm253_vm4, %v218_v1, 0.0  ;;  %v258_v43 = vsel %vm254_vm5, %v219_v2, 0.0 }
  0x1a   : > { %v261_v44 = vsel %vm223_vm0, %v257_v42, 0.0  ;;  %v262_v45 = vsel %vm223_vm0, %v258_v43, 0.0  ;;  %v259_v46 = vsel %vm255_vm6, %v220_v3, 0.0  ;;  %vm256_vm7 = vcmp.eq.s32.totalorder %v222_v18, 3 }
  0x1b   : > { %v231_v14 = vsub.f32 %v218_v1, %v230_v12  ;;  %v232_v15 = vsub.f32 %v219_v2, %v230_v12  ;;  %v233_v16 = vsub.f32 %v220_v3, %v230_v12  ;;  %v234_v17 = vsub.f32 %v221_v4, %v230_v12 }
  0x1c   : > { %v277_v25 = vadd.s32 %v276_v20, %v272_v19  ;;  %v263_v47 = vadd.f32 %v262_v45, %v261_v44  ;;  %v264_v48 = vsel %vm223_vm0, %v259_v46, 0.0  ;;  %v260_v49 = vsel %vm256_vm7, %v221_v4, 0.0 }
  0x1d   : > { %v235_v21 = vmul.f32 1.442695, %v231_v14  ;;  %v237_v22 = vmul.f32 1.442695, %v232_v15  ;;  %v239_v23 = vmul.f32 1.442695, %v233_v16 }
  0x1e   : > { %v241_v24 = vmul.f32 1.442695, %v234_v17  ;;  %vm279_vm2 = vcmp.lt.s32.totalorder %v277_v25, 256  ;;  %v265_v50 = vadd.f32 %v264_v48, %v263_v47  ;;  %v266_v51 = vsel %vm223_vm0, %v260_v49, 0.0 }
  0x1f   : > { %480 = vpow2.f32 %v235_v21  ;;  %vm629_vm3 = vmand %vm278_vm1, %vm279_vm2  ;;  %vm304_vm8 = vcmask (%p211_p6), 0  }
  0x20   : > { %482 = vpow2.f32 %v237_v22  ;;  %v426_v29 = vsel %vm629_vm3, 1.0, %v571_v28  ;;  %v267_v54 = vadd.f32 %v266_v51, %v265_v50 }
  0x21   : > { %484 = vpow2.f32 %v239_v23  ;;  %v288_v30 = vadd.f32 %v426_v29, %v285_v26 }
  0x22   : > { %486 = vpow2.f32 %v241_v24 }
  0x23   : > { %289 = vst [vmem:[#allocation3] sm:$0x3] %v288_v30 }
  0x2a   : > { %v306_v61 = vld [vmem:[#allocation3] sm:$0x3] (%p211_p6) }
  0x2b   : > { %v307_v63 = vsel (%p211_p6), %vm223_vm0, %v306_v61, 0.0 }
  0x2c   : > { %v481_v31 = vpop.eup %480 }
  0x2d   : > { %v483_v32 = vpop.eup %482  ;;  %v243_v33 = vsel %vm223_vm0, %v481_v31, 0.0 }
  0x2e   : > { %v485_v34 = vpop.eup %484  ;;  %v244_v35 = vsel %vm223_vm0, %v483_v32, 0.0 }
  0x2f   : > { %v487_v36 = vpop.eup %486  ;;  %v245_v37 = vadd.f32 %v244_v35, %v243_v33  ;;  %v246_v38 = vsel %vm223_vm0, %v485_v34, 0.0 }
  0x30   : > { %v248_v39 = vsel %vm223_vm0, %v487_v36, 0.0 }
  0x31   : > { %v247_v40 = vadd.f32 %v246_v38, %v245_v37 }
  0x33   : > { %v249_v41 = vadd.f32 %v248_v39, %v247_v40 }
  0x35   : > { %488 = vlog2.f32 %v249_v41 }
  0x42   : > { %v489_v52 = vpop.eup %488 }
  0x43   : > { %v251_v53 = vmul.f32 0.6931472, %v489_v52 }
  0x45   : > { %v252_v55 = vadd.f32 %v251_v53, %v230_v12 }
  0x47   : > { %v268_v56 = vsub.f32 %v252_v55, %v267_v54 }
  0x48   : > { %291 = sbr.rel (!%p211_p6) target bundleno = 291 (0x123), region = 36 }
  0x49   : > { %v282_v58 = vsel %vm629_vm3, %v268_v56, 0.0 }
  0x4a   : > { %v283_v59 = vadd.f32 %v282_v58, %v281_v57 }
  0x4c   : > { %284 = vst [vmem:[#allocation2] sm:$0x3] %v283_v59 }
  0x53   : > { %v292_v60 = vld [vmem:[#allocation2] sm:$0x3] }
  0x54   : > { %v293_v62 = vsel %vm223_vm0, %v292_v60, 0.0 }
  0x55   : > { %294 = vadd.xlane.f32.xlu0 %v293_v62 }
  0x59   : > { %308 = vadd.xlane.f32.xlu0 %v307_v63 }
  0xde   : > { %v295_v0 = vpop.xlane.xlu0 %294 }
  0xdf   : > { %v296_v1 = vrot.slane %v295_v0, 4 }
  0xe1   : > { %v297_v2 = vadd.f32 %v296_v1, %v295_v0 }
  0xe2   : > { %v309_v3 = vpop.xlane.xlu0 %308 }
  0xe3   : > { %v298_v4 = vrot.slane %v297_v2, 2  ;;  %v310_v5 = vrot.slane %v309_v3, 4 }
  0xe5   : > { %v311_v6 = vadd.f32 %v310_v5, %v309_v3  ;;  %v299_v7 = vadd.f32 %v298_v4, %v297_v2 }
  0xe7   : > { %v312_v8 = vrot.slane %v311_v6, 2  ;;  %v300_v9 = vrot.slane %v299_v7, 1 }
  0xe9   : > { %v313_v10 = vadd.f32 %v312_v8, %v311_v6  ;;  %v301_v11 = vadd.f32 %v300_v9, %v299_v7 }
  0xeb   : > { %436 = vpush %v301_v11  ;;  %v314_v12 = vrot.slane %v313_v10, 1 }
  0xed   : > { %v315_v13 = vadd.f32 %v314_v12, %v313_v10 }
  0xef   : > { %438 = vpush %v315_v13 }
 0x11c   : > { %s437_s26 = spop %436 }
 0x11d   : > { %v303_v14 = vstv %s437_s26 }
 0x11e   : > { %305 = vst.msk [vmem:[#allocation4] sm:$0x1] %vm304_vm8, %v303_v14 }
 0x120   : > { %s439_s27 = spop %438 }
 0x121   : > { %v317_v15 = vstv %s439_s27 }
 0x122   : > { %318 = vst.msk [vmem:[#allocation6] sm:$0x1] %vm304_vm8, %v317_v15 }
 0x123 PF: > { %p651_p7 = scmp.eq.s32.totalorder %s417_s15, 1  ;;  %s572_s29 = smov [#allocation4]  }
 0x124   : > { %s326_s30 = sshll.u32 %s572_s29, 4  ;;  %s573_s4 = smov [#allocation6]   ;;  %s327_s30 = int_to_ptr.vmem [resolvable:$true] %s326_s30 }
 0x125   : > { %s337_s5 = sshll.u32 %s573_s4, 4  ;;  %s490_s6 = scalar_lea.vmem %s327_s30, 16  ;;  %s338_s5 = int_to_ptr.vmem [resolvable:$true] %s337_s5 }
 0x126   : > { %p491_p8 = scmp.ne.s32.totalorder %s327_s30, %s490_s6  ;;  %s496_s7 = scalar_lea.vmem %s327_s30, 32 }
 0x127   : > { %p497_p11 = scmp.lt.s32.totalorder %s327_s30, %s327_s30  ;;  %p498_p12 = scmp.lt.s32.totalorder %s496_s7, %s490_s6 }
 0x128   : > { %p492_p9 = pnand %p491_p8, %p651_p7 }
 0x129   : > { %p499_p13 = por %p498_p12, %p497_p11 }
 0x12a   : > { %p493_p10 = pneg %p492_p9 }
 0x12c   : > { %p500_p0 = pnand %p499_p13, %p493_p10 }
 0x12e   : > { %503 = shalt.err (!%p500_p0)
}
 0x12f   : > { %441 = dma.vmem_to_hbm [thread:$0]  (%p651_p7), %s327_s30, 16, %s688_s2, [#allocation5]  }
 0x130   : > { %s514_s10 = scalar_lea.vmem %s338_s5, 16  ;;  %s520_s11 = scalar_lea.vmem %s338_s5, 32 }
 0x131   : > { %p515_p1 = scmp.ne.s32.totalorder %s338_s5, %s514_s10  ;;  %p521_p4 = scmp.lt.s32.totalorder %s338_s5, %s338_s5 }
 0x132   : > { %p522_p5 = scmp.lt.s32.totalorder %s520_s11, %s514_s10 }
 0x133   : > { %p516_p2 = pnand %p515_p1, %p651_p7 }
 0x134   : > { %p523_p6 = por %p522_p5, %p521_p4 }
 0x135   : > { %p517_p3 = pneg %p516_p2 }
 0x137   : > { %p524_p8 = pnand %p523_p6, %p517_p3 }
 0x139   : > { %527 = shalt.err (!%p524_p8)
}
 0x13a   : > { %443 = dma.vmem_to_hbm [thread:$0]  (%p651_p7), %s338_s5, 16, %s689_s3, [#allocation7]  }
 0x13b   : > { %551 = dma.done.wait (%p651_p7), [#allocation5], 16  }
 0x13c   : > { %553 = vsyncadd (%p651_p7), [#allocation5], 4294967280 }
 0x13d   : > { %555 = dma.done.wait (%p651_p7), [#allocation7], 16  }
 0x13e   : > { %557 = vsyncadd (%p651_p7), [#allocation7], 4294967280 }
 0x13f PF: > { %s16_s14 = sadd.s32 1, %s568_s14   ;;  %s693_s12 = smov %s564_s13 }
 0x140   : > { %p13_p9 = scmp.ge.s32.totalorder %s16_s14, 4   ;;  %s694_s13 = smov %s696_s16 }
 0x142   :  { %15 = sbr.rel (!%p13_p9) target bundleno = 3 (0x3), region = 74 }
 0x147   :  { %354 = vsyncpa [#allocation5], 1 }
 0x148   :  { %356 = vsyncpa [#allocation5 + $0x1], 1 }
 0x149   :  { %357 = vsyncpa [#allocation7], 1 }

</bundles_post_ra>
